<compile_context>
chip_gen: v5e
topology: v5e:2x2
jax: 0.10.0
libtpu: 0.0.40
codegen_flags: <defaults>
</compile_context>

<pallas_src>
import math
from functools import partial

import jax
import jax.numpy as jnp
from jax.experimental import pallas as pl
from jax.experimental.pallas import tpu as pltpu


LN_EPS = 1e-5

# ------------------------ chip-aware tuning ------------------------

_TUNING = None


def _get_tuning():
    """Pick ctx/FFN tile sizes and scoped-VMEM budget from the actual chip."""
    global _TUNING
    if _TUNING is None:
        vmem_bytes = 64 * 1024 * 1024        # conservative default (v7x-sized)
        try:
            vmem_bytes = int(pltpu.get_tpu_info().vmem_capacity_bytes)
        except Exception:
            pass
        if vmem_bytes >= 100 * 1024 * 1024:  # v5e / v6e: 128 MiB physical VMEM
            _TUNING = dict(ctx_tile=1024, ffn_tile=512,
                           vmem_limit=96 * 1024 * 1024)
        else:                                # v7x (64 MiB) or unknown
            _TUNING = dict(ctx_tile=512, ffn_tile=256,
                           vmem_limit=48 * 1024 * 1024)
    return _TUNING


def _round_up(x, m):
    return ((x + m - 1) // m) * m


def _layernorm_f32(x, g, b):
    mu = jnp.mean(x, axis=-1, keepdims=True)
    xc = x - mu
    var = jnp.mean(xc * xc, axis=-1, keepdims=True)
    return xc * jax.lax.rsqrt(var + LN_EPS) * g + b


def _gelu_exact(x):
    # erf-based GELU, matching torch.nn.functional.gelu default
    return 0.5 * x * (1.0 + jax.lax.erf(x * (1.0 / math.sqrt(2.0))))


# ------------------------ fused attention-block kernel ------------------------

def _attn_block_kernel(x_ref, ctx_ref, lnx_g_ref, lnx_b_ref, lnc_g_ref, lnc_b_ref,
                       wq_ref, wkv_ref, wo_ref, bo_ref, o_ref,
                       q_scr, k_scr, v_scr, m_scr, l_scr, acc_scr,
                       *, heads, dim_head, scale, ctx_len, ctx_tile):
    j = pl.program_id(1)
    n_kv = pl.num_programs(1)
    inner = heads * dim_head
    need_mask = (ctx_len % ctx_tile) != 0           # static

    @pl.when(j == 0)
    def _init():
        # LN(x) + Q projection once per batch element; the softmax scale is folded
        # into Q here so the hot kv loop never rescales `sim`.
        x = x_ref[0].astype(jnp.float32)                               # (N, D)
        xn = _layernorm_f32(x, lnx_g_ref[...].astype(jnp.float32),
                            lnx_b_ref[...].astype(jnp.float32))
        q = jnp.dot(xn.astype(wq_ref.dtype), wq_ref[...],
                    preferred_element_type=jnp.float32) * scale        # (N, inner)
        for h in range(heads):                                         # head-major, once
            q_scr[h] = q[:, h * dim_head:(h + 1) * dim_head].astype(q_scr.dtype)
        m_scr[...] = jnp.full(m_scr.shape, -jnp.inf, m_scr.dtype)
        l_scr[...] = jnp.zeros(l_scr.shape, l_scr.dtype)
        acc_scr[...] = jnp.zeros(acc_scr.shape, acc_scr.dtype)

    # LN over this context tile, fused with the (bias-free) KV projection.
    c = ctx_ref[0].astype(jnp.float32)                                 # (tk, Dc)
    if need_mask:
        row = jax.lax.broadcasted_iota(jnp.int32, (ctx_tile, 1), 0) + j * ctx_tile
        valid_row = row < ctx_len                                      # (tk, 1)
        col = jax.lax.broadcasted_iota(jnp.int32, (1, ctx_tile), 1) + j * ctx_tile
        valid_col = col < ctx_len                                      # (1, tk)
        # Zero padded rows BEFORE LN / projection so K/V stay finite (no 0*Inf NaNs).
        c = jnp.where(valid_row, c, 0.0)
    cn = _layernorm_f32(c, lnc_g_ref[...].astype(jnp.float32),
                        lnc_b_ref[...].astype(jnp.float32))
    kv = jnp.dot(cn.astype(wkv_ref.dtype), wkv_ref[...],
                 preferred_element_type=jnp.float32)                   # (tk, 2*inner)
    for h in range(heads):                                             # head-major K/V scratch
        k_scr[h] = kv[:, h * dim_head:(h + 1) * dim_head].astype(k_scr.dtype)
        v_scr[h] = kv[:, inner + h * dim_head:
                      inner + (h + 1) * dim_head].astype(v_scr.dtype)

    # Flash-style online-softmax accumulation; fori_loop bounds per-head live ranges.
    def _head_step(h, carry):
        qh = q_scr[h]                                                  # (N, dh)
        kh = k_scr[h]                                                  # (tk, dh)
        vh = v_scr[h]                                                  # (tk, dh)
        sim = jax.lax.dot_general(qh, kh, (((1,), (1,)), ((), ())),
                                  preferred_element_type=jnp.float32)  # (N, tk)
        if need_mask:
            sim = jnp.where(valid_col, sim, -jnp.inf)
        m_prev = m_scr[h]                                              # (N, 1)
        m_new = jnp.maximum(m_prev, jnp.max(sim, axis=-1, keepdims=True))
        alpha = jnp.exp(m_prev - m_new)
        p = jnp.exp(sim - m_new)                                       # (N, tk)
        l_scr[h] = alpha * l_scr[h] + jnp.sum(p, axis=-1, keepdims=True)
        acc_scr[h] = alpha * acc_scr[h] + jnp.dot(p.astype(vh.dtype), vh,
                                                  preferred_element_type=jnp.float32)
        m_scr[h] = m_new
        return carry

    jax.lax.fori_loop(0, heads, _head_step, None, unroll=True)

    @pl.when(j == n_kv - 1)
    def _finalize():
        # Normalize and out-project head by head, accumulating directly into an f32
        # (N, D) value (no bf16 concat scratch); then bias + residual add.
        n, d = o_ref.shape[1], o_ref.shape[2]
        y = jnp.zeros((n, d), jnp.float32)
        for h in range(heads):
            out_h = acc_scr[h] / l_scr[h]                              # exact normalization
            y = y + jnp.dot(out_h.astype(wo_ref.dtype), wo_ref[h],
                            preferred_element_type=jnp.float32)
        y = y + bo_ref[...].astype(jnp.float32)
        o_ref[0] = (y + x_ref[0].astype(jnp.float32)).astype(o_ref.dtype)


def attention_block(x, ctx, ctx_ln_g, ctx_ln_b, p, heads, dim_head):
    # x: (B, N, D) latents; ctx: (B, M, Dc) context (ctx = x for self-attention).
    b, n, d = x.shape
    _, m, dc = ctx.shape
    inner = heads * dim_head
    scale = dim_head ** -0.5
    tune = _get_tuning()
    tk = m if m <= tune["ctx_tile"] else tune["ctx_tile"]
    n_kv = -(-m // tk)
    mm_dtype = p["wq"].dtype
    wo_hm = p["wo"].reshape(heads, dim_head, d)    # head-major out-projection weight

    kernel = partial(_attn_block_kernel, heads=heads, dim_head=dim_head,
                     scale=scale, ctx_len=m, ctx_tile=tk)
    return pl.pallas_call(
        kernel,
        out_shape=jax.ShapeDtypeStruct((b, n, d), x.dtype),
        grid=(b, n_kv),
        in_specs=[
            pl.BlockSpec((1, n, d), lambda i, j: (i, 0, 0)),        # x (resident over kv tiles)
            pl.BlockSpec((1, tk, dc), lambda i, j: (i, j, 0)),      # context tile
            pl.BlockSpec((1, d), lambda i, j: (0, 0)),              # LN(x) gamma
            pl.BlockSpec((1, d), lambda i, j: (0, 0)),              # LN(x) beta
            pl.BlockSpec((1, dc), lambda i, j: (0, 0)),             # LN(ctx) gamma
            pl.BlockSpec((1, dc), lambda i, j: (0, 0)),             # LN(ctx) beta
            pl.BlockSpec((d, inner), lambda i, j: (0, 0)),          # Wq
            pl.BlockSpec((dc, 2 * inner), lambda i, j: (0, 0)),     # Wkv
            pl.BlockSpec((heads, dim_head, d), lambda i, j: (0, 0, 0)),  # Wo (head-major)
            pl.BlockSpec((1, d), lambda i, j: (0, 0)),              # bo
        ],
        out_specs=pl.BlockSpec((1, n, d), lambda i, j: (i, 0, 0)),
        scratch_shapes=[
            pltpu.VMEM((heads, n, dim_head), mm_dtype),             # Q * scale (head-major)
            pltpu.VMEM((heads, tk, dim_head), mm_dtype),            # K (head-major)
            pltpu.VMEM((heads, tk, dim_head), mm_dtype),            # V (head-major)
            pltpu.VMEM((heads, n, 1), jnp.float32),                 # running max
            pltpu.VMEM((heads, n, 1), jnp.float32),                 # running denom
            pltpu.VMEM((heads, n, dim_head), jnp.float32),          # running numerator
        ],
        compiler_params=pltpu.CompilerParams(
            dimension_semantics=("parallel", "arbitrary"),
            vmem_limit_bytes=tune["vmem_limit"]),
    )(x, ctx,
      p["ln_g"].reshape(1, d), p["ln_b"].reshape(1, d),
      ctx_ln_g.reshape(1, dc), ctx_ln_b.reshape(1, dc),
      p["wq"], p["wkv"], wo_hm, p["bo"].reshape(1, d))


# ------------------------ fused feed-forward-block kernel ------------------------

def _ffn_block_kernel(x_ref, ln_g_ref, ln_b_ref, wa_ref, ba_ref, wg_ref, bg_ref,
                      w2_ref, b2_ref, o_ref):
    x = x_ref[...].astype(jnp.float32)                                 # (tm, D)
    xn = _layernorm_f32(x, ln_g_ref[...].astype(jnp.float32),
                        ln_b_ref[...].astype(jnp.float32))
    xn_mm = xn.astype(wa_ref.dtype)
    # W1 split into Wa / Wg: halves the peak live f32 intermediate vs one (tm, 2*d_ff)
    # block + lane slice; GEGLU applied as the epilogue of the second matmul.
    a = jnp.dot(xn_mm, wa_ref[...],
                preferred_element_type=jnp.float32) + ba_ref[...].astype(jnp.float32)
    g = jnp.dot(xn_mm, wg_ref[...],
                preferred_element_type=jnp.float32) + bg_ref[...].astype(jnp.float32)
    y = a * _gelu_exact(g)
    out = jnp.dot(y.astype(w2_ref.dtype), w2_ref[...],
                  preferred_element_type=jnp.float32) + b2_ref[...].astype(jnp.float32)
    o_ref[...] = (out + x).astype(o_ref.dtype)                         # fused residual


def feedforward_block(x, p):
    b, n, d = x.shape
    x2 = x.reshape(b * n, d)
    mrows = b * n
    tune = _get_tuning()
    tm = mrows if mrows <= tune["ffn_tile"] else tune["ffn_tile"]
    n_mt = -(-mrows // tm)
    d_ff = p["w2"].shape[0]

    out = pl.pallas_call(
        _ffn_block_kernel,
        out_shape=jax.ShapeDtypeStruct((mrows, d), x.dtype),
        grid=(n_mt,),
        in_specs=[
            pl.BlockSpec((tm, d), lambda i: (i, 0)),
            pl.BlockSpec((1, d), lambda i: (0, 0)),
            pl.BlockSpec((1, d), lambda i: (0, 0)),
            pl.BlockSpec((d, d_ff), lambda i: (0, 0)),       # Wa
            pl.BlockSpec((1, d_ff), lambda i: (0, 0)),       # ba
            pl.BlockSpec((d, d_ff), lambda i: (0, 0)),       # Wg
            pl.BlockSpec((1, d_ff), lambda i: (0, 0)),       # bg
            pl.BlockSpec((d_ff, d), lambda i: (0, 0)),       # W2
            pl.BlockSpec((1, d), lambda i: (0, 0)),          # b2
        ],
        out_specs=pl.BlockSpec((tm, d), lambda i: (i, 0)),
        compiler_params=pltpu.CompilerParams(
            dimension_semantics=("parallel",),
            vmem_limit_bytes=tune["vmem_limit"]),
    )(x2, p["ln_g"].reshape(1, d), p["ln_b"].reshape(1, d),
      p["wa"], p["ba"].reshape(1, d_ff), p["wg"], p["bg"].reshape(1, d_ff),
      p["w2"], p["b2"].reshape(1, d))
    return out.reshape(b, n, d)


# ------------------------ fused classifier-head kernel ------------------------

def _head_kernel(x_ref, ln_g_ref, ln_b_ref, w_ref, b_ref, o_ref, *, n_latents):
    # Batched head: mean-pool all B rows, LN, then ONE (B, D) x (D, C_pad) matmul.
    x = x_ref[...].astype(jnp.float32)                                 # (B, N, D)
    pooled = jnp.sum(x, axis=1) * (1.0 / n_latents)                    # (B, D)
    xn = _layernorm_f32(pooled, ln_g_ref[...].astype(jnp.float32),
                        ln_b_ref[...].astype(jnp.float32))
    y = jnp.dot(xn.astype(w_ref.dtype), w_ref[...],
                preferred_element_type=jnp.float32) + b_ref[...].astype(jnp.float32)
    o_ref[...] = y.astype(o_ref.dtype)


def classifier_head(x, p):
    b, n, d = x.shape
    c = p["w"].shape[1]
    c_pad = _round_up(max(c, 128), 128)          # lane-dense output store, slice outside
    w_pad = jnp.zeros((d, c_pad), p["w"].dtype).at[:, :c].set(p["w"])
    b_pad = jnp.zeros((1, c_pad), jnp.float32).at[0, :c].set(p["b"])
    tune = _get_tuning()

    out = pl.pallas_call(
        partial(_head_kernel, n_latents=n),
        out_shape=jax.ShapeDtypeStruct((b, c_pad), x.dtype),
        grid=(1,),
        in_specs=[
            pl.BlockSpec((b, n, d), lambda i: (0, 0, 0)),
            pl.BlockSpec((1, d), lambda i: (0, 0)),
            pl.BlockSpec((1, d), lambda i: (0, 0)),
            pl.BlockSpec((d, c_pad), lambda i: (0, 0)),
            pl.BlockSpec((1, c_pad), lambda i: (0, 0)),
        ],
        out_specs=pl.BlockSpec((b, c_pad), lambda i: (0, 0)),
        compiler_params=pltpu.CompilerParams(
            dimension_semantics=("arbitrary",),
            vmem_limit_bytes=tune["vmem_limit"]),
    )(x, p["ln_g"].reshape(1, d), p["ln_b"].reshape(1, d), w_pad, b_pad)
    return out[:, :c]


# ------------------------------ JAX glue ------------------------------

def fourier_encode_positions(axis, max_freq, num_bands, dtype):
    axis_pos = [jnp.linspace(-1.0, 1.0, s, dtype=dtype) for s in axis]
    pos = jnp.stack(jnp.meshgrid(*axis_pos, indexing="ij"), axis=-1)    # (*axis, na)
    x = pos[..., None]                                                  # (*axis, na, 1)
    scales = jnp.linspace(1.0, max_freq / 2.0, num_bands, dtype=dtype)
    xs = x * scales * math.pi                                           # (*axis, na, K)
    enc = jnp.concatenate([jnp.sin(xs), jnp.cos(xs), x], axis=-1)       # (*axis, na, 2K+1)
    return enc.reshape(*axis, -1)


def receive_perceiver_forward(params, data, latents, cfg, return_embeddings=False):
    b = data.shape[0]
    axis = data.shape[1:-1]
    assert len(axis) == cfg["input_axis"]
    assert latents.shape[1] == cfg["num_latents"]
    assert latents.shape[2] == cfg["latent_dim"]

    if cfg["fourier_encode_data"]:
        enc = fourier_encode_positions(axis, cfg["max_freq"],
                                       cfg["num_freq_bands"], data.dtype)
        enc = jnp.broadcast_to(enc[None], (b, *axis, enc.shape[-1]))
        data = jnp.concatenate([data, enc], axis=-1)

    # NOTE: the context feature dim is intentionally left unpadded — typical Perceiver
    # input dims (~22-64) already lane-pad inside VMEM, and padding them to 128 in HBM
    # would multiply the (large) context DMA traffic.
    data = data.reshape(b, -1, data.shape[-1])      # (B, M, input_dim)
    x = latents

    for layer in params["layers"]:
        ca = layer["cross_attn"]
        x = attention_block(x, data, ca["lnc_g"], ca["lnc_b"], ca,
                            cfg["cross_heads"], cfg["cross_dim_head"])
        x = feedforward_block(x, layer["cross_ff"])
        for sa, sf in layer["self_attns"]:
            # self-attention: context = LN(x) with the SAME norm as queries (PreNorm semantics)
            x = attention_block(x, x, sa["ln_g"], sa["ln_b"], sa,
                                cfg["latent_heads"], cfg["latent_dim_head"])
            x = feedforward_block(x, sf)

    if return_embeddings:
        return x
    return classifier_head(x, params["head"])


# ------------------------------ parameter init ------------------------------

def _init_attn(key, qdim, cdim, heads, dim_head, with_context_norm, w_dtype):
    inner = heads * dim_head
    k1, k2, k3 = jax.random.split(key, 3)
    p = {
        "ln_g": jnp.ones((qdim,), jnp.float32),
        "ln_b": jnp.zeros((qdim,), jnp.float32),
        "wq": (0.02 * jax.random.normal(k1, (qdim, inner), jnp.float32)).astype(w_dtype),
        "wkv": (0.02 * jax.random.normal(k2, (cdim, 2 * inner), jnp.float32)).astype(w_dtype),
        "wo": (0.02 * jax.random.normal(k3, (inner, qdim), jnp.float32)).astype(w_dtype),
        "bo": jnp.zeros((qdim,), jnp.float32),
    }
    if with_context_norm:
        p["lnc_g"] = jnp.ones((cdim,), jnp.float32)
        p["lnc_b"] = jnp.zeros((cdim,), jnp.float32)
    return p


def _init_ff(key, dim, w_dtype, mult=4):
    k1, k2, k3 = jax.random.split(key, 3)
    d_ff = dim * mult
    return {
        "ln_g": jnp.ones((dim,), jnp.float32),
        "ln_b": jnp.zeros((dim,), jnp.float32),
        # W1 of the reference Linear(dim, 2*d_ff) stored pre-split into Wa / Wg.
        "wa": (0.02 * jax.random.normal(k1, (dim, d_ff), jnp.float32)).astype(w_dtype),
        "ba": jnp.zeros((d_ff,), jnp.float32),
        "wg": (0.02 * jax.random.normal(k2, (dim, d_ff), jnp.float32)).astype(w_dtype),
        "bg": jnp.zeros((d_ff,), jnp.float32),
        "w2": (0.02 * jax.random.normal(k3, (d_ff, dim), jnp.float32)).astype(w_dtype),
        "b2": jnp.zeros((dim,), jnp.float32),
    }


def init_params(key, cfg):
    input_dim = (cfg["input_axis"] * (2 * cfg["num_freq_bands"] + 1)
                 + cfg["input_channels"])
    ld = cfg["latent_dim"]
    w_dtype = cfg.get("matmul_dtype", jnp.bfloat16)   # bf16 MXU operands, f32 accumulation
    keys = iter(jax.random.split(
        key, 4 * cfg["depth"] * (2 + cfg["self_per_cross_attn"]) + 8))

    layers = []
    for _ in range(cfg["depth"]):
        cross_attn = _init_attn(next(keys), ld, input_dim,
                                cfg["cross_heads"], cfg["cross_dim_head"],
                                with_context_norm=True, w_dtype=w_dtype)
        cross_ff = _init_ff(next(keys), ld, w_dtype)
        selfs = []
        for _ in range(cfg["self_per_cross_attn"]):
            selfs.append((_init_attn(next(keys), ld, ld,
                                     cfg["latent_heads"], cfg["latent_dim_head"],
                                     with_context_norm=False, w_dtype=w_dtype),
                          _init_ff(next(keys), ld, w_dtype)))
        layers.append({"cross_attn": cross_attn, "cross_ff": cross_ff,
                       "self_attns": selfs})

    head = {
        "ln_g": jnp.ones((ld,), jnp.float32),
        "ln_b": jnp.zeros((ld,), jnp.float32),
        "w": (0.02 * jax.random.normal(next(keys), (ld, cfg["num_classes"]),
                                       jnp.float32)).astype(w_dtype),
        "b": jnp.zeros((cfg["num_classes"],), jnp.float32),
    }
    return {"layers": layers, "head": head}


# ------------------------------------ main ----------------------------------

if __name__ == "__main__":
    cfg = dict(
        num_freq_bands=4, depth=2, max_freq=10.0,
        input_channels=4, input_axis=2,
        num_latents=8, latent_dim=32,
        cross_heads=1, latent_heads=4,
        cross_dim_head=16, latent_dim_head=8,
        num_classes=10, self_per_cross_attn=1,
        fourier_encode_data=True,
        matmul_dtype=jnp.bfloat16,
    )

    key = jax.random.PRNGKey(0)
    kp, kd, kl = jax.random.split(key, 3)
    params = init_params(kp, cfg)

    # data: (B, H, W, C) channels-last; latents: (B, num_latents, latent_dim)
    data = jax.random.normal(kd, (2, 8, 8, cfg["input_channels"]), jnp.float32)
    latents = jax.random.normal(kl, (2, cfg["num_latents"], cfg["latent_dim"]), jnp.float32)

    logits = receive_perceiver_forward(params, data, latents, cfg)
    logits = jax.block_until_ready(logits)
    assert logits.shape == (2, cfg["num_classes"])
    print("KERNEL_OK")
</pallas_src>

<mosaic_0001>
module attributes {stable_mosaic.version = 11 : i64} {
  func.func @_attn_block_kernel(%arg0: i32, %arg1: i32, %arg2: memref<1x8x32xf32, #tpu.memory_space<vmem>>, %arg3: memref<1x64x22xf32, #tpu.memory_space<vmem>>, %arg4: memref<1x32xf32, #tpu.memory_space<vmem>>, %arg5: memref<1x32xf32, #tpu.memory_space<vmem>>, %arg6: memref<1x22xf32, #tpu.memory_space<vmem>>, %arg7: memref<1x22xf32, #tpu.memory_space<vmem>>, %arg8: memref<32x16xbf16, #tpu.memory_space<vmem>>, %arg9: memref<22x32xbf16, #tpu.memory_space<vmem>>, %arg10: memref<1x16x32xbf16, #tpu.memory_space<vmem>>, %arg11: memref<1x32xf32, #tpu.memory_space<vmem>>, %arg12: memref<1x8x32xf32, #tpu.memory_space<vmem>>, %arg13: memref<1x8x16xbf16, #tpu.memory_space<vmem>>, %arg14: memref<1x64x16xbf16, #tpu.memory_space<vmem>>, %arg15: memref<1x64x16xbf16, #tpu.memory_space<vmem>>, %arg16: memref<1x8x1xf32, #tpu.memory_space<vmem>>, %arg17: memref<1x8x1xf32, #tpu.memory_space<vmem>>, %arg18: memref<1x8x16xf32, #tpu.memory_space<vmem>>) attributes {dimension_semantics = [#tpu.dimension_semantics<parallel>, #tpu.dimension_semantics<arbitrary>], iteration_bounds = array<i64: 2, 1>, scalar_prefetch = 0 : i64, scratch_operands = 6 : i64, tpu.core_type = #tpu.core_type<tc>, window_params = [{transform_indices = @transform_0, window_bounds = array<i64: 1, 8, 32>}, {transform_indices = @transform_1, window_bounds = array<i64: 1, 64, 22>}, {pipeline_mode = #tpu.pipeline_mode<synchronous>, transform_indices = @transform_2, window_bounds = array<i64: 1, 32>}, {pipeline_mode = #tpu.pipeline_mode<synchronous>, transform_indices = @transform_3, window_bounds = array<i64: 1, 32>}, {pipeline_mode = #tpu.pipeline_mode<synchronous>, transform_indices = @transform_4, window_bounds = array<i64: 1, 22>}, {pipeline_mode = #tpu.pipeline_mode<synchronous>, transform_indices = @transform_5, window_bounds = array<i64: 1, 22>}, {pipeline_mode = #tpu.pipeline_mode<synchronous>, transform_indices = @transform_6, window_bounds = array<i64: 32, 16>}, {pipeline_mode = #tpu.pipeline_mode<synchronous>, transform_indices = @transform_7, window_bounds = array<i64: 22, 32>}, {pipeline_mode = #tpu.pipeline_mode<synchronous>, transform_indices = @transform_8, window_bounds = array<i64: 1, 16, 32>}, {pipeline_mode = #tpu.pipeline_mode<synchronous>, transform_indices = @transform_9, window_bounds = array<i64: 1, 32>}, {transform_indices = @transform_10, window_bounds = array<i64: 1, 8, 32>}]} {
    %c0_i32 = arith.constant 0 : i32
    %0 = arith.cmpi eq, %arg1, %c0_i32 : i32
    %1 = arith.extui %0 : i1 to i32
    %c0_i32_0 = arith.constant 0 : i32
    %2 = arith.cmpi ne, %1, %c0_i32_0 : i32
    scf.if %2 {
      %c0_45 = arith.constant 0 : index
      %c0_46 = arith.constant 0 : index
      %c0_47 = arith.constant 0 : index
      %91 = vector.load %arg2[%c0_45, %c0_46, %c0_47] : memref<1x8x32xf32, #tpu.memory_space<vmem>>, vector<1x8x32xf32>
      %92 = vector.shape_cast %91 : vector<1x8x32xf32> to vector<8x32xf32>
      %c0_48 = arith.constant 0 : index
      %c0_49 = arith.constant 0 : index
      %93 = vector.load %arg4[%c0_48, %c0_49] : memref<1x32xf32, #tpu.memory_space<vmem>>, vector<1x32xf32>
      %c0_50 = arith.constant 0 : index
      %c0_51 = arith.constant 0 : index
      %94 = vector.load %arg5[%c0_50, %c0_51] : memref<1x32xf32, #tpu.memory_space<vmem>>, vector<1x32xf32>
      %cst_52 = arith.constant dense<0.000000e+00> : vector<8xf32>
      %95 = vector.multi_reduction <add>, %92, %cst_52 [1] : vector<8x32xf32> to vector<8xf32>
      %96 = vector.shape_cast %95 : vector<8xf32> to vector<8x1xf32>
      %cst_53 = arith.constant 3.200000e+01 : f32
      %97 = vector.broadcast %cst_53 : f32 to vector<8x1xf32>
      %98 = arith.divf %96, %97 : vector<8x1xf32>
      %99 = vector.broadcast %98 : vector<8x1xf32> to vector<8x32xf32>
      %100 = arith.subf %92, %99 : vector<8x32xf32>
      %101 = arith.mulf %100, %100 : vector<8x32xf32>
      %cst_54 = arith.constant dense<0.000000e+00> : vector<8xf32>
      %102 = vector.multi_reduction <add>, %101, %cst_54 [1] : vector<8x32xf32> to vector<8xf32>
      %103 = vector.shape_cast %102 : vector<8xf32> to vector<8x1xf32>
      %cst_55 = arith.constant 3.200000e+01 : f32
      %104 = vector.broadcast %cst_55 : f32 to vector<8x1xf32>
      %105 = arith.divf %103, %104 : vector<8x1xf32>
      %cst_56 = arith.constant 9.99999974E-6 : f32
      %106 = vector.broadcast %cst_56 : f32 to vector<8x1xf32>
      %107 = arith.addf %105, %106 : vector<8x1xf32>
      %108 = math.rsqrt %107 : vector<8x1xf32>
      %109 = vector.broadcast %108 : vector<8x1xf32> to vector<8x32xf32>
      %110 = arith.mulf %100, %109 : vector<8x32xf32>
      %111 = vector.broadcast %93 : vector<1x32xf32> to vector<8x32xf32>
      %112 = arith.mulf %110, %111 : vector<8x32xf32>
      %113 = vector.broadcast %94 : vector<1x32xf32> to vector<8x32xf32>
      %114 = arith.addf %112, %113 : vector<8x32xf32>
      %115 = arith.truncf %114 : vector<8x32xf32> to vector<8x32xbf16>
      %c0_57 = arith.constant 0 : index
      %c0_58 = arith.constant 0 : index
      %116 = vector.load %arg8[%c0_57, %c0_58] : memref<32x16xbf16, #tpu.memory_space<vmem>>, vector<32x16xbf16>
      %cst_59 = arith.constant dense<0.000000e+00> : vector<8x16xf32>
      %117 = tpu.matmul %115, %116, %cst_59 {dimension_numbers = #tpu.dot_dimension_numbers<[1], [0], [0], [1], [0, 0, 1, 1], [], []>} : vector<8x32xbf16>, vector<32x16xbf16>, vector<8x16xf32> -> vector<8x16xf32>
      %cst_60 = arith.constant 2.500000e-01 : f32
      %118 = vector.broadcast %cst_60 : f32 to vector<8x16xf32>
      %119 = arith.mulf %117, %118 : vector<8x16xf32>
      %120 = arith.truncf %119 : vector<8x16xf32> to vector<8x16xbf16>
      %c0_61 = arith.constant 0 : index
      %c0_62 = arith.constant 0 : index
      %c0_63 = arith.constant 0 : index
      %121 = vector.load %arg13[%c0_61, %c0_62, %c0_63] : memref<1x8x16xbf16, #tpu.memory_space<vmem>>, vector<1x8x16xbf16>
      %122 = vector.shape_cast %121 : vector<1x8x16xbf16> to vector<8x16xbf16>
      %123 = vector.shape_cast %120 : vector<8x16xbf16> to vector<1x8x16xbf16>
      tpu.vector_store %arg13[%c0_61, %c0_62, %c0_63], %123 {strides = array<i32>} : memref<1x8x16xbf16, #tpu.memory_space<vmem>>, vector<1x8x16xbf16>,
      %cst_64 = arith.constant 0xFF800000 : f32
      %124 = vector.broadcast %cst_64 : f32 to vector<1x8x1xf32>
      %c0_65 = arith.constant 0 : index
      %c0_66 = arith.constant 0 : index
      %c0_67 = arith.constant 0 : index
      %125 = vector.load %arg16[%c0_65, %c0_66, %c0_67] : memref<1x8x1xf32, #tpu.memory_space<vmem>>, vector<1x8x1xf32>
      tpu.vector_store %arg16[%c0_65, %c0_66, %c0_67], %124 {strides = array<i32>} : memref<1x8x1xf32, #tpu.memory_space<vmem>>, vector<1x8x1xf32>,
      %cst_68 = arith.constant 0.000000e+00 : f32
      %126 = vector.broadcast %cst_68 : f32 to vector<1x8x1xf32>
      %c0_69 = arith.constant 0 : index
      %c0_70 = arith.constant 0 : index
      %c0_71 = arith.constant 0 : index
      %127 = vector.load %arg17[%c0_69, %c0_70, %c0_71] : memref<1x8x1xf32, #tpu.memory_space<vmem>>, vector<1x8x1xf32>
      tpu.vector_store %arg17[%c0_69, %c0_70, %c0_71], %126 {strides = array<i32>} : memref<1x8x1xf32, #tpu.memory_space<vmem>>, vector<1x8x1xf32>,
      %cst_72 = arith.constant 0.000000e+00 : f32
      %128 = vector.broadcast %cst_72 : f32 to vector<1x8x16xf32>
      %c0_73 = arith.constant 0 : index
      %c0_74 = arith.constant 0 : index
      %c0_75 = arith.constant 0 : index
      %129 = vector.load %arg18[%c0_73, %c0_74, %c0_75] : memref<1x8x16xf32, #tpu.memory_space<vmem>>, vector<1x8x16xf32>
      tpu.vector_store %arg18[%c0_73, %c0_74, %c0_75], %128 {strides = array<i32>} : memref<1x8x16xf32, #tpu.memory_space<vmem>>, vector<1x8x16xf32>,
    } else {
    }
    %c0 = arith.constant 0 : index
    %c0_1 = arith.constant 0 : index
    %c0_2 = arith.constant 0 : index
    %3 = vector.load %arg3[%c0, %c0_1, %c0_2] : memref<1x64x22xf32, #tpu.memory_space<vmem>>, vector<1x64x22xf32>
    %4 = vector.shape_cast %3 : vector<1x64x22xf32> to vector<64x22xf32>
    %c0_3 = arith.constant 0 : index
    %c0_4 = arith.constant 0 : index
    %5 = vector.load %arg6[%c0_3, %c0_4] : memref<1x22xf32, #tpu.memory_space<vmem>>, vector<1x22xf32>
    %c0_5 = arith.constant 0 : index
    %c0_6 = arith.constant 0 : index
    %6 = vector.load %arg7[%c0_5, %c0_6] : memref<1x22xf32, #tpu.memory_space<vmem>>, vector<1x22xf32>
    %cst = arith.constant dense<0.000000e+00> : vector<64xf32>
    %7 = vector.multi_reduction <add>, %4, %cst [1] : vector<64x22xf32> to vector<64xf32>
    %8 = vector.shape_cast %7 : vector<64xf32> to vector<64x1xf32>
    %cst_7 = arith.constant 2.200000e+01 : f32
    %9 = vector.broadcast %cst_7 : f32 to vector<64x1xf32>
    %10 = arith.divf %8, %9 : vector<64x1xf32>
    %11 = vector.broadcast %10 : vector<64x1xf32> to vector<64x22xf32>
    %12 = arith.subf %4, %11 : vector<64x22xf32>
    %13 = arith.mulf %12, %12 : vector<64x22xf32>
    %cst_8 = arith.constant dense<0.000000e+00> : vector<64xf32>
    %14 = vector.multi_reduction <add>, %13, %cst_8 [1] : vector<64x22xf32> to vector<64xf32>
    %15 = vector.shape_cast %14 : vector<64xf32> to vector<64x1xf32>
    %cst_9 = arith.constant 2.200000e+01 : f32
    %16 = vector.broadcast %cst_9 : f32 to vector<64x1xf32>
    %17 = arith.divf %15, %16 : vector<64x1xf32>
    %cst_10 = arith.constant 9.99999974E-6 : f32
    %18 = vector.broadcast %cst_10 : f32 to vector<64x1xf32>
    %19 = arith.addf %17, %18 : vector<64x1xf32>
    %20 = math.rsqrt %19 : vector<64x1xf32>
    %21 = vector.broadcast %20 : vector<64x1xf32> to vector<64x22xf32>
    %22 = arith.mulf %12, %21 : vector<64x22xf32>
    %23 = vector.broadcast %5 : vector<1x22xf32> to vector<64x22xf32>
    %24 = arith.mulf %22, %23 : vector<64x22xf32>
    %25 = vector.broadcast %6 : vector<1x22xf32> to vector<64x22xf32>
    %26 = arith.addf %24, %25 : vector<64x22xf32>
    %27 = arith.truncf %26 : vector<64x22xf32> to vector<64x22xbf16>
    %c0_11 = arith.constant 0 : index
    %c0_12 = arith.constant 0 : index
    %28 = vector.load %arg9[%c0_11, %c0_12] : memref<22x32xbf16, #tpu.memory_space<vmem>>, vector<22x32xbf16>
    %cst_13 = arith.constant dense<0.000000e+00> : vector<64x32xf32>
    %29 = tpu.matmul %27, %28, %cst_13 {dimension_numbers = #tpu.dot_dimension_numbers<[1], [0], [0], [1], [0, 0, 1, 1], [], []>} : vector<64x22xbf16>, vector<22x32xbf16>, vector<64x32xf32> -> vector<64x32xf32>
    %30 = vector.extract_strided_slice %29 {offsets = [0, 0], sizes = [64, 16], strides = [1, 1]} : vector<64x32xf32> to vector<64x16xf32>
    %31 = arith.truncf %30 : vector<64x16xf32> to vector<64x16xbf16>
    %c0_14 = arith.constant 0 : index
    %c0_15 = arith.constant 0 : index
    %c0_16 = arith.constant 0 : index
    %32 = vector.load %arg14[%c0_14, %c0_15, %c0_16] : memref<1x64x16xbf16, #tpu.memory_space<vmem>>, vector<1x64x16xbf16>
    %33 = vector.shape_cast %32 : vector<1x64x16xbf16> to vector<64x16xbf16>
    %34 = vector.shape_cast %31 : vector<64x16xbf16> to vector<1x64x16xbf16>
    tpu.vector_store %arg14[%c0_14, %c0_15, %c0_16], %34 {strides = array<i32>} : memref<1x64x16xbf16, #tpu.memory_space<vmem>>, vector<1x64x16xbf16>,
    %35 = vector.extract_strided_slice %29 {offsets = [0, 16], sizes = [64, 16], strides = [1, 1]} : vector<64x32xf32> to vector<64x16xf32>
    %36 = arith.truncf %35 : vector<64x16xf32> to vector<64x16xbf16>
    %c0_17 = arith.constant 0 : index
    %c0_18 = arith.constant 0 : index
    %c0_19 = arith.constant 0 : index
    %37 = vector.load %arg15[%c0_17, %c0_18, %c0_19] : memref<1x64x16xbf16, #tpu.memory_space<vmem>>, vector<1x64x16xbf16>
    %38 = vector.shape_cast %37 : vector<1x64x16xbf16> to vector<64x16xbf16>
    %39 = vector.shape_cast %36 : vector<64x16xbf16> to vector<1x64x16xbf16>
    tpu.vector_store %arg15[%c0_17, %c0_18, %c0_19], %39 {strides = array<i32>} : memref<1x64x16xbf16, #tpu.memory_space<vmem>>, vector<1x64x16xbf16>,
    %c0_i32_20 = arith.constant 0 : i32
    %40 = arith.index_cast %c0_i32_20 : i32 to index
    %c0_21 = arith.constant 0 : index
    %c0_22 = arith.constant 0 : index
    %41 = vector.load %arg13[%40, %c0_21, %c0_22] : memref<1x8x16xbf16, #tpu.memory_space<vmem>>, vector<1x8x16xbf16>
    %42 = vector.shape_cast %41 : vector<1x8x16xbf16> to vector<8x16xbf16>
    %43 = arith.index_cast %c0_i32_20 : i32 to index
    %c0_23 = arith.constant 0 : index
    %c0_24 = arith.constant 0 : index
    %44 = vector.load %arg14[%43, %c0_23, %c0_24] : memref<1x64x16xbf16, #tpu.memory_space<vmem>>, vector<1x64x16xbf16>
    %45 = vector.shape_cast %44 : vector<1x64x16xbf16> to vector<64x16xbf16>
    %46 = arith.index_cast %c0_i32_20 : i32 to index
    %c0_25 = arith.constant 0 : index
    %c0_26 = arith.constant 0 : index
    %47 = vector.load %arg15[%46, %c0_25, %c0_26] : memref<1x64x16xbf16, #tpu.memory_space<vmem>>, vector<1x64x16xbf16>
    %48 = vector.shape_cast %47 : vector<1x64x16xbf16> to vector<64x16xbf16>
    %cst_27 = arith.constant dense<0.000000e+00> : vector<8x64xf32>
    %49 = tpu.matmul %42, %45, %cst_27 {dimension_numbers = #tpu.dot_dimension_numbers<[1], [1], [0], [0], [0, 0, 1, 0], [], []>} : vector<8x16xbf16>, vector<64x16xbf16>, vector<8x64xf32> -> vector<8x64xf32>
    %50 = arith.index_cast %c0_i32_20 : i32 to index
    %c0_28 = arith.constant 0 : index
    %c0_29 = arith.constant 0 : index
    %51 = vector.load %arg16[%50, %c0_28, %c0_29] : memref<1x8x1xf32, #tpu.memory_space<vmem>>, vector<1x8x1xf32>
    %52 = vector.shape_cast %51 : vector<1x8x1xf32> to vector<8x1xf32>
    %cst_30 = arith.constant dense<0xFF800000> : vector<8xf32>
    %53 = vector.multi_reduction <maximumf>, %49, %cst_30 [1] : vector<8x64xf32> to vector<8xf32>
    %54 = vector.shape_cast %53 : vector<8xf32> to vector<8x1xf32>
    %55 = arith.maximumf %52, %54 : vector<8x1xf32>
    %56 = arith.subf %52, %55 : vector<8x1xf32>
    %57 = math.exp %56 : vector<8x1xf32>
    %58 = vector.broadcast %55 : vector<8x1xf32> to vector<8x64xf32>
    %59 = arith.subf %49, %58 : vector<8x64xf32>
    %60 = math.exp %59 : vector<8x64xf32>
    %61 = arith.index_cast %c0_i32_20 : i32 to index
    %c0_31 = arith.constant 0 : index
    %c0_32 = arith.constant 0 : index
    %62 = vector.load %arg17[%61, %c0_31, %c0_32] : memref<1x8x1xf32, #tpu.memory_space<vmem>>, vector<1x8x1xf32>
    %63 = vector.shape_cast %62 : vector<1x8x1xf32> to vector<8x1xf32>
    %64 = arith.mulf %57, %63 : vector<8x1xf32>
    %cst_33 = arith.constant dense<0.000000e+00> : vector<8xf32>
    %65 = vector.multi_reduction <add>, %60, %cst_33 [1] : vector<8x64xf32> to vector<8xf32>
    %66 = vector.shape_cast %65 : vector<8xf32> to vector<8x1xf32>
    %67 = arith.addf %64, %66 : vector<8x1xf32>
    %68 = arith.index_cast %c0_i32_20 : i32 to index
    %c0_34 = arith.constant 0 : index
    %c0_35 = arith.constant 0 : index
    %69 = vector.load %arg17[%68, %c0_34, %c0_35] : memref<1x8x1xf32, #tpu.memory_space<vmem>>, vector<1x8x1xf32>
    %70 = vector.shape_cast %69 : vector<1x8x1xf32> to vector<8x1xf32>
    %71 = vector.shape_cast %67 : vector<8x1xf32> to vector<1x8x1xf32>
    tpu.vector_store %arg17[%68, %c0_34, %c0_35], %71 {strides = array<i32>} : memref<1x8x1xf32, #tpu.memory_space<vmem>>, vector<1x8x1xf32>,
    %72 = arith.index_cast %c0_i32_20 : i32 to index
    %c0_36 = arith.constant 0 : index
    %c0_37 = arith.constant 0 : index
    %73 = vector.load %arg18[%72, %c0_36, %c0_37] : memref<1x8x16xf32, #tpu.memory_space<vmem>>, vector<1x8x16xf32>
    %74 = vector.shape_cast %73 : vector<1x8x16xf32> to vector<8x16xf32>
    %75 = vector.broadcast %57 : vector<8x1xf32> to vector<8x16xf32>
    %76 = arith.mulf %75, %74 : vector<8x16xf32>
    %77 = arith.truncf %60 : vector<8x64xf32> to vector<8x64xbf16>
    %cst_38 = arith.constant dense<0.000000e+00> : vector<8x16xf32>
    %78 = tpu.matmul %77, %48, %cst_38 {dimension_numbers = #tpu.dot_dimension_numbers<[1], [0], [0], [1], [0, 0, 1, 1], [], []>} : vector<8x64xbf16>, vector<64x16xbf16>, vector<8x16xf32> -> vector<8x16xf32>
    %79 = arith.addf %76, %78 : vector<8x16xf32>
    %80 = arith.index_cast %c0_i32_20 : i32 to index
    %c0_39 = arith.constant 0 : index
    %c0_40 = arith.constant 0 : index
    %81 = vector.load %arg18[%80, %c0_39, %c0_40] : memref<1x8x16xf32, #tpu.memory_space<vmem>>, vector<1x8x16xf32>
    %82 = vector.shape_cast %81 : vector<1x8x16xf32> to vector<8x16xf32>
    %83 = vector.shape_cast %79 : vector<8x16xf32> to vector<1x8x16xf32>
    tpu.vector_store %arg18[%80, %c0_39, %c0_40], %83 {strides = array<i32>} : memref<1x8x16xf32, #tpu.memory_space<vmem>>, vector<1x8x16xf32>,
    %84 = arith.index_cast %c0_i32_20 : i32 to index
    %c0_41 = arith.constant 0 : index
    %c0_42 = arith.constant 0 : index
    %85 = vector.load %arg16[%84, %c0_41, %c0_42] : memref<1x8x1xf32, #tpu.memory_space<vmem>>, vector<1x8x1xf32>
    %86 = vector.shape_cast %85 : vector<1x8x1xf32> to vector<8x1xf32>
    %87 = vector.shape_cast %55 : vector<8x1xf32> to vector<1x8x1xf32>
    tpu.vector_store %arg16[%84, %c0_41, %c0_42], %87 {strides = array<i32>} : memref<1x8x1xf32, #tpu.memory_space<vmem>>, vector<1x8x1xf32>,
    %c1_i32 = arith.constant 1 : i32
    %c0_i32_43 = arith.constant 0 : i32
    %88 = arith.cmpi eq, %arg1, %c0_i32_43 : i32
    %89 = arith.extui %88 : i1 to i32
    %c0_i32_44 = arith.constant 0 : i32
    %90 = arith.cmpi ne, %89, %c0_i32_44 : i32
    scf.if %90 {
      %cst_45 = arith.constant 0.000000e+00 : f32
      %91 = vector.broadcast %cst_45 : f32 to vector<8x32xf32>
      %c0_46 = arith.constant 0 : index
      %c0_47 = arith.constant 0 : index
      %c0_48 = arith.constant 0 : index
      %92 = vector.load %arg18[%c0_46, %c0_47, %c0_48] : memref<1x8x16xf32, #tpu.memory_space<vmem>>, vector<1x8x16xf32>
      %93 = vector.shape_cast %92 : vector<1x8x16xf32> to vector<8x16xf32>
      %c0_49 = arith.constant 0 : index
      %c0_50 = arith.constant 0 : index
      %c0_51 = arith.constant 0 : index
      %94 = vector.load %arg17[%c0_49, %c0_50, %c0_51] : memref<1x8x1xf32, #tpu.memory_space<vmem>>, vector<1x8x1xf32>
      %95 = vector.shape_cast %94 : vector<1x8x1xf32> to vector<8x1xf32>
      %96 = vector.broadcast %95 : vector<8x1xf32> to vector<8x16xf32>
      %97 = arith.divf %93, %96 : vector<8x16xf32>
      %98 = arith.truncf %97 : vector<8x16xf32> to vector<8x16xbf16>
      %c0_52 = arith.constant 0 : index
      %c0_53 = arith.constant 0 : index
      %c0_54 = arith.constant 0 : index
      %99 = vector.load %arg10[%c0_52, %c0_53, %c0_54] : memref<1x16x32xbf16, #tpu.memory_space<vmem>>, vector<1x16x32xbf16>
      %100 = vector.shape_cast %99 : vector<1x16x32xbf16> to vector<16x32xbf16>
      %cst_55 = arith.constant dense<0.000000e+00> : vector<8x32xf32>
      %101 = tpu.matmul %98, %100, %cst_55 {dimension_numbers = #tpu.dot_dimension_numbers<[1], [0], [0], [1], [0, 0, 1, 1], [], []>} : vector<8x16xbf16>, vector<16x32xbf16>, vector<8x32xf32> -> vector<8x32xf32>
      %102 = arith.addf %91, %101 : vector<8x32xf32>
      %c0_56 = arith.constant 0 : index
      %c0_57 = arith.constant 0 : index
      %103 = vector.load %arg11[%c0_56, %c0_57] : memref<1x32xf32, #tpu.memory_space<vmem>>, vector<1x32xf32>
      %104 = vector.broadcast %103 : vector<1x32xf32> to vector<8x32xf32>
      %105 = arith.addf %102, %104 : vector<8x32xf32>
      %c0_58 = arith.constant 0 : index
      %c0_59 = arith.constant 0 : index
      %c0_60 = arith.constant 0 : index
      %106 = vector.load %arg2[%c0_58, %c0_59, %c0_60] : memref<1x8x32xf32, #tpu.memory_space<vmem>>, vector<1x8x32xf32>
      %107 = vector.shape_cast %106 : vector<1x8x32xf32> to vector<8x32xf32>
      %108 = arith.addf %105, %107 : vector<8x32xf32>
      %c0_61 = arith.constant 0 : index
      %c0_62 = arith.constant 0 : index
      %c0_63 = arith.constant 0 : index
      %109 = vector.load %arg12[%c0_61, %c0_62, %c0_63] : memref<1x8x32xf32, #tpu.memory_space<vmem>>, vector<1x8x32xf32>
      %110 = vector.shape_cast %109 : vector<1x8x32xf32> to vector<8x32xf32>
      %111 = vector.shape_cast %108 : vector<8x32xf32> to vector<1x8x32xf32>
      tpu.vector_store %arg12[%c0_61, %c0_62, %c0_63], %111 {strides = array<i32>} : memref<1x8x32xf32, #tpu.memory_space<vmem>>, vector<1x8x32xf32>,
    } else {
    }
    return
  }
  func.func @transform_0(%arg0: i32, %arg1: i32) -> (i32, i32, i32) {
    %c0_i32 = arith.constant 0 : i32
    %c0_i32_0 = arith.constant 0 : i32
    %c0_i32_1 = arith.constant 0 : i32
    return %arg0, %c0_i32, %c0_i32_0 : i32, i32, i32
  }
  func.func @transform_1(%arg0: i32, %arg1: i32) -> (i32, i32, i32) {
    %c0_i32 = arith.constant 0 : i32
    %c0_i32_0 = arith.constant 0 : i32
    return %arg0, %arg1, %c0_i32 : i32, i32, i32
  }
  func.func @transform_2(%arg0: i32, %arg1: i32) -> (i32, i32) {
    %c0_i32 = arith.constant 0 : i32
    %c0_i32_0 = arith.constant 0 : i32
    %c0_i32_1 = arith.constant 0 : i32
    return %c0_i32, %c0_i32_0 : i32, i32
  }
  func.func @transform_3(%arg0: i32, %arg1: i32) -> (i32, i32) {
    %c0_i32 = arith.constant 0 : i32
    %c0_i32_0 = arith.constant 0 : i32
    %c0_i32_1 = arith.constant 0 : i32
    return %c0_i32, %c0_i32_0 : i32, i32
  }
  func.func @transform_4(%arg0: i32, %arg1: i32) -> (i32, i32) {
    %c0_i32 = arith.constant 0 : i32
    %c0_i32_0 = arith.constant 0 : i32
    %c0_i32_1 = arith.constant 0 : i32
    return %c0_i32, %c0_i32_0 : i32, i32
  }
  func.func @transform_5(%arg0: i32, %arg1: i32) -> (i32, i32) {
    %c0_i32 = arith.constant 0 : i32
    %c0_i32_0 = arith.constant 0 : i32
    %c0_i32_1 = arith.constant 0 : i32
    return %c0_i32, %c0_i32_0 : i32, i32
  }
  func.func @transform_6(%arg0: i32, %arg1: i32) -> (i32, i32) {
    %c0_i32 = arith.constant 0 : i32
    %c0_i32_0 = arith.constant 0 : i32
    %c0_i32_1 = arith.constant 0 : i32
    return %c0_i32, %c0_i32_0 : i32, i32
  }
  func.func @transform_7(%arg0: i32, %arg1: i32) -> (i32, i32) {
    %c0_i32 = arith.constant 0 : i32
    %c0_i32_0 = arith.constant 0 : i32
    %c0_i32_1 = arith.constant 0 : i32
    return %c0_i32, %c0_i32_0 : i32, i32
  }
  func.func @transform_8(%arg0: i32, %arg1: i32) -> (i32, i32, i32) {
    %c0_i32 = arith.constant 0 : i32
    %c0_i32_0 = arith.constant 0 : i32
    %c0_i32_1 = arith.constant 0 : i32
    %c0_i32_2 = arith.constant 0 : i32
    return %c0_i32, %c0_i32_0, %c0_i32_1 : i32, i32, i32
  }
  func.func @transform_9(%arg0: i32, %arg1: i32) -> (i32, i32) {
    %c0_i32 = arith.constant 0 : i32
    %c0_i32_0 = arith.constant 0 : i32
    %c0_i32_1 = arith.constant 0 : i32
    return %c0_i32, %c0_i32_0 : i32, i32
  }
  func.func @transform_10(%arg0: i32, %arg1: i32) -> (i32, i32, i32) {
    %c0_i32 = arith.constant 0 : i32
    %c0_i32_0 = arith.constant 0 : i32
    %c0_i32_1 = arith.constant 0 : i32
    return %arg0, %c0_i32, %c0_i32_0 : i32, i32, i32
  }
}

</mosaic_0001>

<bundles_post_ra>
// kernel: tpu_custom_call.1
= control target key start
LH: loop header
LB: loop body
LE: loop exit
PB: predicated region body
PF: predicated region fallthrough
CT: control target
= control target key end

     0   :  { %s1794_s0 = inlined_call_operand.vmem [shape: f32[2,8,32], index: 0, kind: input, shape index: {}]   ;;  %s1795_s1 = inlined_call_operand.vmem [shape: f32[2,64,22], index: 1, kind: input, shape index: {}]   ;;  %s1796_s2 = inlined_call_operand.vmem [shape: f32[1,32], index: 2, kind: input, shape index: {}]   ;;  %s1797_s3 = inlined_call_operand.vmem [shape: f32[1,32], index: 3, kind: input, shape index: {}]   ;;  %s1798_s4 = inlined_call_operand.vmem [shape: f32[1,22], index: 4, kind: input, shape index: {}]   ;;  %s1799_s5 = inlined_call_operand.vmem [shape: f32[1,22], index: 5, kind: input, shape index: {}]   ;;  %s1800_s6 = inlined_call_operand.vmem [shape: bf16[32,16], index: 6, kind: input, shape index: {}]   ;;  %s1801_s7 = inlined_call_operand.vmem [shape: bf16[22,32], index: 7, kind: input, shape index: {}]   ;;  %s1802_s8 = inlined_call_operand.vmem [shape: bf16[1,16,32], index: 8, kind: input, shape index: {}]   ;;  %s1803_s9 = inlined_call_operand.vmem [shape: f32[1,32], index: 9, kind: input, shape index: {}]   ;;  %s1804_s10 = inlined_call_operand.hbm [shape: f32[2,8,32], index: 10, kind: output, shape index: {}]  }
   0x1   :  { %1805 = sst [smem:[#allocation11_spill]] %s1794_s0 }
   0x2   :  { %1806 = sst [smem:[#allocation12_spill]] %s1795_s1 }
   0x3   :  { %15 = vsyncpa [#allocation9], 0 }
   0x4   :  { %17 = vsyncpa [#allocation9 + $0x1], 0  ;;  %s1447_s13 = smov 0   ;;  %s1449_s14 = smov 0  }
   0x5   :  { %s1451_s15 = smov 0   ;;  %s1453_s16 = smov 0  }
   0x6   :  { %s1455_s17 = smov 0   ;;  %s1457_s18 = smov 0  }
   0x7 LB: > { %s1126_s19 = sadd.s32 4294967295, %s1384_s18   ;;  %s1127_s20 = sadd.s32 4294967294, %s1384_s18   ;;  %s1384_s18 = sphi %s1457_s18, %s23_s18   ;;  %s1380_s17 = sphi %s1455_s17, %s1821_s17   ;;  %s1376_s16 = sphi %s1453_s16, %s1820_s16   ;;  %s1372_s15 = sphi %s1451_s15, %s1819_s15   ;;  %s1368_s14 = sphi %s1449_s14, %s1818_s14   ;;  %s1364_s13 = sphi %s1447_s13, %s1817_s13  }
   0x8   : > { %s35_s21 = sadd.s32 1, %s1380_s17  ;;  %s264_s22 = sadd.s32 1, %s1372_s15 }
   0x9   : > { %p37_p0 = scmp.ge.s32.totalorder %s35_s21, 2  ;;  %p274_p1 = scmp.ne.s32.totalorder %s1372_s15, %s1368_s14 }
   0xa   : > { %p275_p2 = scmp.eq.s32.totalorder %s1126_s19, 1  ;;  %p280_p3 = scmp.ne.s32.totalorder %s1368_s14, %s1364_s13 }
   0xb   : > { %s1823_s21 = smov (%p37_p0, %s35_s21), 0  ;;  %p281_p5 = scmp.eq.s32.totalorder %s1127_s20, 1 }
   0xc   : > { %p1487_p4 = por %p275_p2, %p274_p1  ;;  %s261_s24 = ssub.s32 %s1380_s17, %s1823_s21 }
   0xd   : > { %p1130_p6 = scmp.ge.s32.totalorder %s1384_s18, 1  ;;  %p262_p7 = scmp.eq.s32.totalorder %s261_s24, 0 }
   0xe   : > { %p1494_p8 = por %p281_p5, %p280_p3  ;;  %p343_p9 = scmp.lt.s32.totalorder %s1384_s18, 3 }
   0xf   : > { %s1500_s26 = scalar_select %p262_p7, %s1372_s15, %s264_s22  }
  0x10   : > { %p344_p10 = pnand %p1130_p6, %p343_p9 }
  0x11   : > { %p389_p11 = scmp.lt.s32.totalorder (!%p344_p10), %s1376_s16, 1  ;;  %s1809_s1 = sld [smem:[#allocation12_spill]] (!%p344_p10) }
  0x12   : > { %347 = sbr.rel (%p344_p10) target bundleno = 1353 (0x549), region = 60  ;;  %s1810_s0 = sld [smem:[#allocation11_spill]] (!%p344_p10) }
  0x17   : > { %s1504_s27 = scalar_select %p389_p11, %s1376_s16, 1  ;;  %vm501_vm0 = vcmask 179200   ;;  %v1386_v16 = vmov 22.0   ;;  %vm411_vm2 = vcmask 261120   ;;  %vm735_vm3 = vcmask 1042432  }
  0x18   : > { %1278 = vrcp.f32 %v1386_v16 }
  0x19   : > { %s1195_s28 = sshll.u32 %s1504_s27, 6  ;;  %s1132_s12 = sshll.u32 %s1504_s27, 3 }
  0x1a   : > { %s401_s11 = scalar_lea.vmem %s1809_s1, %s1195_s28  ;;  %s392_s22 = scalar_lea.vmem %s1810_s0, %s1132_s12 }
  0x1b   : > { %v493_v0 = vld [vmem:[%s401_s11 + $0x10] sm:$0xff]  ;;  %v491_v1 = vld [vmem:[%s401_s11] sm:$0xff]  ;;  %v494_v6 = vld [vmem:[%s401_s11 + $0x18] sm:$0xff]  ;;  %s1388_s12 = smov 112   ;;  %s1192_s27 = sshll.u32 %s1376_s16, 3 }
  0x1c   : > { %v497_v2 = vld [vmem:[%s401_s11 + $0x30] sm:$0xff]  ;;  %v508_v3 = vsel %vm501_vm0, %v493_v0, 0.0  ;;  %v502_v4 = vsel %vm501_vm0, %v491_v1, 0.0  ;;  %v492_v7 = vld [vmem:[%s401_s11 + $0x8] sm:$0xff]  ;;  %v498_v8 = vld [vmem:[%s401_s11 + $0x38] sm:$0xff]  ;;  %v511_v9 = vsel %vm501_vm0, %v494_v6, 0.0 }
  0x1d   : > { %v520_v5 = vsel %vm501_vm0, %v497_v2, 0.0  ;;  %509 = vadd.xlane.f32.xlu1 %v508_v3  ;;  %503 = vadd.xlane.f32.xlu0 %v502_v4  ;;  %v505_v10 = vsel %vm501_vm0, %v492_v7, 0.0  ;;  %v523_v11 = vsel %vm501_vm0, %v498_v8, 0.0  ;;  %v496_v12 = vld [vmem:[%s401_s11 + $0x28] sm:$0xff]  ;;  %v495_v13 = vld [vmem:[%s401_s11 + $0x20] sm:$0xff] }
  0x1e   : > { %521 = vadd.xlane.f32.xlu2 %v520_v5  ;;  %v517_v14 = vsel %vm501_vm0, %v496_v12, 0.0  ;;  %v514_v15 = vsel %vm501_vm0, %v495_v13, 0.0  ;;  %v1279_v17 = vpop.eup %1278  ;;  %v1563_v57 = vld [vmem:[%s392_s22] sm:$0xff]  ;;  %v713_v3 = vld [vmem:[%s1801_s7 + $0x8] sm:$0x7]  ;;  %s386_s22 = sand.u32 1, %s1368_s14  }
  0x1f   : > { %v527_v18 = vmul.f32 22.0, %v1279_v17  ;;  %vm531_vm1 = vweird.f32 %v1279_v17  ;;  %v412_v61 = vsel %vm411_vm2, %v1563_v57, 0.0  ;;  %v719_v5 = vunpack.c.l.b16 %v713_v3  ;;  %s1131_s24 = sshll.u32 %s386_s22, 3  ;;  %s1026_s16 = scalar_lea.sflag [#allocation9], %s386_s22 }
  0x20   : > { %s388_s19 = scalar_lea.vmem [#allocation8], %s1131_s24  ;;  %s1326_s24 = scalar_lea.hbm %s1804_s10, 16 }
  0x21   : > { %v528_v19 = vsub.f32 1.0, %v527_v18  ;;  %s1038_s20 = sshll.u32 %s388_s19, 4  ;;  %s1039_s20 = int_to_ptr.vmem [resolvable:$true] %s1038_s20 }
  0x23   : > { %v529_v20 = vmul.f32 %v1279_v17, %v528_v19 }
  0x25   : > { %512 = vadd.xlane.f32.xlu1 %v511_v9  ;;  %506 = vadd.xlane.f32.xlu0 %v505_v10  ;;  %v530_v21 = vadd.f32 %v1279_v17, %v529_v20  ;;  %v721_v9 = vpack.c.b16 %v719_v5, %v719_v5 }
  0x26   : > { %524 = vadd.xlane.f32.xlu2 %v523_v11 }
  0x27   : > { %v1518_v22 = vsel %vm531_vm1, %v1279_v17, %v530_v21 }
  0x2d   : > { %518 = vadd.xlane.f32.xlu1 %v517_v14  ;;  %515 = vadd.xlane.f32.xlu0 %v514_v15  ;;  %v1198_v14 = vld [vmem:[%s1801_s7] sm:$0xff] }
  0x90   : > { %v510_v23 = vpop.xlane.xlu1 %509  ;;  %v504_v24 = vpop.xlane.xlu0 %503 }
  0x91   : > { %v535_v25 = vmul.f32 %v1518_v22, %v510_v23  ;;  %v533_v26 = vmul.f32 %v1518_v22, %v504_v24  ;;  %v522_v27 = vpop.xlane.xlu2 %521 }
  0x92   : > { %v539_v28 = vmul.f32 %v1518_v22, %v522_v27 }
  0x93   : > { %v1523_v29 = vsub.f32 %v493_v0, %v535_v25  ;;  %v1525_v30 = vsub.f32 %v491_v1, %v533_v26  ;;  %v1387_v1 = vmov 32.0  }
  0x94   : > { %v1527_v31 = vsub.f32 %v497_v2, %v539_v28  ;;  %1280 = vrcp.f32 %v1387_v1 }
  0x95   : > { %v551_v32 = vmul.f32 %v1523_v29, %v1523_v29  ;;  %v549_v33 = vmul.f32 %v1525_v30, %v1525_v30 }
  0x96   : > { %v555_v41 = vmul.f32 %v1527_v31, %v1527_v31 }
  0x97   : > { %v563_v34 = vsel %vm501_vm0, %v551_v32, 0.0  ;;  %v557_v35 = vsel %vm501_vm0, %v549_v33, 0.0 }
  0x98   : > { %564 = vadd.xlane.f32.xlu1 %v563_v34  ;;  %v513_v36 = vpop.xlane.xlu1 %512  ;;  %558 = vadd.xlane.f32.xlu2 %v557_v35  ;;  %v507_v37 = vpop.xlane.xlu0 %506  ;;  %v575_v46 = vsel %vm501_vm0, %v555_v41, 0.0 }
  0x99   : > { %v536_v38 = vmul.f32 %v1518_v22, %v513_v36  ;;  %v534_v39 = vmul.f32 %v1518_v22, %v507_v37  ;;  %v525_v40 = vpop.xlane.xlu2 %524 }
  0x9a   : > { %v540_v42 = vmul.f32 %v1518_v22, %v525_v40  ;;  %v1281_v2 = vpop.eup %1280 }
  0x9b   : > { %v1540_v43 = vsub.f32 %v494_v6, %v536_v38  ;;  %v1542_v44 = vsub.f32 %v492_v7, %v534_v39  ;;  %v416_v4 = vmul.f32 32.0, %v1281_v2  ;;  %vm420_vm4 = vweird.f32 %v1281_v2 }
  0x9c   : > { %v1544_v45 = vsub.f32 %v498_v8, %v540_v42 }
  0x9d   : > { %v552_v47 = vmul.f32 %v1540_v43, %v1540_v43  ;;  %v550_v48 = vmul.f32 %v1542_v44, %v1542_v44  ;;  %v417_v11 = vsub.f32 1.0, %v416_v4 }
  0x9e   : > { %v556_v54 = vmul.f32 %v1544_v45, %v1544_v45 }
  0x9f   : > { %v566_v49 = vsel %vm501_vm0, %v552_v47, 0.0  ;;  %v560_v50 = vsel %vm501_vm0, %v550_v48, 0.0  ;;  %v418_v15 = vmul.f32 %v1281_v2, %v417_v11 }
  0xa0   : > { %576 = vadd.xlane.f32.xlu1 %v575_v46  ;;  %v519_v51 = vpop.xlane.xlu1 %518  ;;  %567 = vadd.xlane.f32.xlu2 %v566_v49  ;;  %v516_v52 = vpop.xlane.xlu0 %515  ;;  %v578_v59 = vsel %vm501_vm0, %v556_v54, 0.0 }
  0xa1   : > { %v538_v53 = vmul.f32 %v1518_v22, %v519_v51  ;;  %561 = vadd.xlane.f32.xlu0 %v560_v50  ;;  %v537_v55 = vmul.f32 %v1518_v22, %v516_v52  ;;  %v419_v26 = vadd.f32 %v1281_v2, %v418_v15 }
  0xa3   : > { %v1561_v56 = vsub.f32 %v496_v12, %v538_v53  ;;  %v1568_v60 = vsub.f32 %v495_v13, %v537_v55  ;;  %v737_v12 = vsel %vm735_vm3, %v721_v9, 0  ;;  %v1596_v34 = vsel %vm420_vm4, %v1281_v2, %v419_v26 }
  0xa4   : > { %745 = vmatpush.bf16.msra.mxu1 %v737_v12  ;;  %1208 = vmatpush.bf16.msra.mxu3 %v737_v12 }
  0xa5   : > { %v554_v58 = vmul.f32 %v1561_v56, %v1561_v56  ;;  %v553_v63 = vmul.f32 %v1568_v60, %v1568_v60 }
  0xa7   : > { %v572_v62 = vsel %vm501_vm0, %v554_v58, 0.0  ;;  %v569_v0 = vsel %vm501_vm0, %v553_v63, 0.0 }
  0xa8   : > { %573 = vadd.xlane.f32.xlu1 %v572_v62  ;;  %579 = vadd.xlane.f32.xlu2 %v578_v59 }
  0xa9   : > { %413 = vadd.xlane.f32.xlu0 %v412_v61  ;;  %746 = vmatpush.bf16.msra.mxu1 %v1198_v14 }
  0xaa   : > { %1209 = vmatpush.bf16.msra.mxu3 %v1198_v14 }
  0xb1   : > { %570 = vadd.xlane.f32.xlu0 %v569_v0 }
 0x10b   : > { %v565_v6 = vpop.xlane.xlu1 %564  ;;  %v559_v7 = vpop.xlane.xlu2 %558 }
 0x10c   : > { %v581_v8 = vmul.f32 %v559_v7, %v1518_v22  ;;  %v583_v13 = vmul.f32 %v565_v6, %v1518_v22 }
 0x10e   : > { %v589_v10 = vadd.f32 1e-05, %v581_v8  ;;  %v1584_v16 = vadd.f32 1e-05, %v583_v13 }
 0x110   : > { %1282 = vrsqrt.f32 %v589_v10  ;;  %vm603_vm6 = vweird.f32 %v589_v10  ;;  %vm623_vm4 = vweird.f32 %v1584_v16 }
 0x111   : > { %1284 = vrsqrt.f32 %v1584_v16 }
 0x113   : > { %v577_v17 = vpop.xlane.xlu1 %576  ;;  %v568_v18 = vpop.xlane.xlu2 %567 }
 0x114   : > { %v587_v19 = vmul.f32 %v577_v17, %v1518_v22  ;;  %v584_v20 = vmul.f32 %v568_v18, %v1518_v22  ;;  %v562_v21 = vpop.xlane.xlu0 %561  ;;  %v1643_v17 = vld [vmem:[%s1798_s4] ss:$0 sm:$0xff] }
 0x115   : > { %v582_v23 = vmul.f32 %v562_v21, %v1518_v22 }
 0x116   : > { %v1589_v24 = vadd.f32 1e-05, %v587_v19  ;;  %v1591_v25 = vadd.f32 1e-05, %v584_v20  ;;  %v1283_v27 = vpop.eup %1282 }
 0x117   : > { %v590_v28 = vadd.f32 1e-05, %v582_v23  ;;  %v598_v32 = vmul.f32 %v1283_v27, %v589_v10  ;;  %v1599_v39 = vpop.eup %1284  ;;  %vm604_vm5 = vweird.f32 %v1283_v27 }
 0x118   : > { %1286 = vrsqrt.f32 %v1589_v24  ;;  %v618_v53 = vmul.f32 %v1599_v39, %v1584_v16  ;;  %vm1624_vm7 = vmor %vm603_vm6, %vm604_vm5  ;;  %vm663_vm8 = vweird.f32 %v1589_v24  ;;  %vm633_vm14 = vweird.f32 %v1591_v25 }
 0x119   : > { %1288 = vrsqrt.f32 %v1591_v25  ;;  %v599_v33 = vmul.f32 %v1283_v27, %v598_v32  ;;  %vm613_vm11 = vweird.f32 %v590_v28  ;;  %vm624_vm5 = vweird.f32 %v1599_v39 }
 0x11a   : > { %1290 = vrsqrt.f32 %v590_v28  ;;  %v619_v2 = vmul.f32 %v1599_v39, %v618_v53 }
 0x11b   : > { %v580_v35 = vpop.xlane.xlu2 %579  ;;  %v600_v36 = vmul.f32 0.5, %v599_v33  ;;  %v574_v46 = vpop.xlane.xlu1 %573 }
 0x11c   : > { %v588_v37 = vmul.f32 %v580_v35, %v1518_v22  ;;  %v414_v38 = vpop.xlane.xlu0 %413  ;;  %v586_v58 = vmul.f32 %v574_v46, %v1518_v22  ;;  %v620_v14 = vmul.f32 0.5, %v619_v2 }
 0x11d   : > { %v422_v40 = vmul.f32 %v1596_v34, %v414_v38  ;;  %v601_v42 = vsub.f32 1.5, %v600_v36 }
 0x11e   : > { %v1602_v41 = vpop.eup %1286  ;;  %v1608_v49 = vadd.f32 1e-05, %v588_v37  ;;  %v1628_v5 = vadd.f32 1e-05, %v586_v58 }
 0x11f   : > { %v1604_v47 = vpop.eup %1288  ;;  %v658_v48 = vmul.f32 %v1602_v41, %v1589_v24  ;;  %v1613_v52 = vsub.f32 %v1563_v57, %v422_v40  ;;  %v602_v59 = vmul.f32 %v1283_v27, %v601_v42  ;;  %vm664_vm10 = vweird.f32 %v1602_v41 }
 0x120   : > { %v1291_v50 = vpop.eup %1290  ;;  %v628_v51 = vmul.f32 %v1604_v47, %v1591_v25  ;;  %1292 = vrsqrt.f32 %v1608_v49  ;;  %vm1649_vm13 = vmor %vm663_vm8, %vm664_vm10  ;;  %vm634_vm15 = vweird.f32 %v1604_v47  ;;  %vm673_vm1 = vweird.f32 %v1608_v49 }
 0x121   : > { %v659_v54 = vmul.f32 %v1602_v41, %v658_v48  ;;  %v608_v55 = vmul.f32 %v1291_v50, %v590_v28  ;;  %v424_v0 = vmul.f32 %v1613_v52, %v1613_v52  ;;  %v606_v7 = vsel %vm1624_vm7, %v1283_v27, %v602_v59  ;;  %v1274_v28 = vld [vmem:[%s1799_s5] ss:$0 sm:$0xff]  ;;  %vm1671_vm6 = vmor %vm633_vm14, %vm634_vm15 }
 0x122   : > { %v629_v63 = vmul.f32 %v1604_v47, %v628_v51  ;;  %vm614_vm9 = vweird.f32 %v1291_v50  ;;  %1294 = vrsqrt.f32 %v1628_v5  ;;  %v621_v27 = vsub.f32 1.5, %v620_v14  ;;  %vm625_vm8 = vmor %vm623_vm4, %vm624_vm5 }
 0x123   : > { %v660_v61 = vmul.f32 0.5, %v659_v54  ;;  %v609_v62 = vmul.f32 %v1291_v50, %v608_v55  ;;  %v425_v9 = vsel %vm411_vm2, %v424_v0, 0.0  ;;  %vm615_vm12 = vmor %vm613_vm11, %vm614_vm9  ;;  %vm653_vm11 = vweird.f32 %v1628_v5 }
 0x124   : > { %v571_v1 = vpop.xlane.xlu0 %570  ;;  %426 = vadd.xlane.f32.xlu2 %v425_v9  ;;  %v630_v11 = vmul.f32 0.5, %v629_v63  ;;  %v622_v16 = vmul.f32 %v1599_v39, %v621_v27  ;;  %vm489_vm4 = vcmask 130048   ;;  %vm486_vm5 = vcmask 7168  }
 0x125   : > { %v610_v4 = vmul.f32 0.5, %v609_v62  ;;  %v585_v6 = vmul.f32 %v571_v1, %v1518_v22  ;;  %v661_v8 = vsub.f32 1.5, %v660_v61  ;;  %v677_v22 = vmul.f32 %v606_v7, %v1525_v30 }
 0x126   : > { %v1293_v13 = vpop.eup %1292  ;;  %v631_v21 = vsub.f32 1.5, %v630_v11  ;;  %v626_v58 = vsel %vm625_vm8, %v1599_v39, %v622_v16 }
 0x127   : > { %v611_v10 = vsub.f32 1.5, %v610_v4  ;;  %v1636_v12 = vadd.f32 1e-05, %v585_v6  ;;  %v662_v18 = vmul.f32 %v1602_v41, %v661_v8  ;;  %v668_v19 = vmul.f32 %v1293_v13, %v1608_v49 }
 0x128   : > { %v688_v24 = vmul.f32 %v1643_v17, %v677_v22  ;;  %vm674_vm3 = vweird.f32 %v1293_v13  ;;  %v1295_v35 = vpop.eup %1294  ;;  %v632_v36 = vmul.f32 %v1604_v47, %v631_v21  ;;  %v679_v0 = vmul.f32 %v626_v58, %v1523_v29 }
 0x129   : > { %v612_v15 = vmul.f32 %v1291_v50, %v611_v10  ;;  %1296 = vrsqrt.f32 %v1636_v12  ;;  %v669_v26 = vmul.f32 %v1293_v13, %v668_v19  ;;  %v666_v32 = vsel %vm1649_vm13, %v1602_v41, %v662_v18  ;;  %vm675_vm7 = vmor %vm673_vm1, %vm674_vm3  ;;  %v1197_v19 = vld [vmem:[%s1800_s6 + $0x8] sm:$0xff] }
 0x12a   : > { %v683_v42 = vmul.f32 %v666_v32, %v1527_v31  ;;  %v699_v46 = vadd.f32 %v1274_v28, %v688_v24  ;;  %v648_v48 = vmul.f32 %v1295_v35, %v1628_v5  ;;  %v636_v53 = vsel %vm1671_vm6, %v1604_v47, %v632_v36  ;;  %475 = vmatpush.bf16.msra.mxu0 %v1197_v19 }
 0x12b   : > { %v616_v30 = vsel %vm615_vm12, %v1291_v50, %v612_v15  ;;  %v670_v33 = vmul.f32 0.5, %v669_v26  ;;  %v680_v61 = vmul.f32 %v636_v53, %v1540_v43  ;;  %v690_v6 = vmul.f32 %v1643_v17, %v679_v0 }
 0x12c   : > { %v678_v23 = vmul.f32 %v616_v30, %v1542_v44  ;;  %v694_v49 = vmul.f32 %v1643_v17, %v683_v42  ;;  %v649_v59 = vmul.f32 %v1295_v35, %v648_v48  ;;  %vm643_vm9 = vweird.f32 %v1636_v12 }
 0x12d   : > { %v671_v38 = vsub.f32 1.5, %v670_v33  ;;  %vm654_vm12 = vweird.f32 %v1295_v35  ;;  %v701_v7 = vadd.f32 %v1274_v28, %v690_v6  ;;  %vm484_vm3 = vcmask 125952  }
 0x12e   : > { %v689_v44 = vmul.f32 %v1643_v17, %v678_v23  ;;  %v705_v1 = vadd.f32 %v1274_v28, %v694_v49  ;;  %v650_v2 = vmul.f32 0.5, %v649_v59  ;;  %vm655_vm14 = vmor %vm653_vm11, %vm654_vm12  ;;  %vm892_vm6 = vcmask 523264  }
 0x12f   : > { %v1297_v41 = vpop.eup %1296  ;;  %v672_v50 = vmul.f32 %v1293_v13, %v671_v38  ;;  %v1390_v19 = vmov 0  }
 0x130   : > { %v700_v40 = vadd.f32 %v1274_v28, %v689_v44  ;;  %v638_v25 = vmul.f32 %v1297_v41, %v1636_v12  ;;  %v651_v39 = vsub.f32 1.5, %v650_v2  ;;  %vm644_vm10 = vweird.f32 %v1297_v41  ;;  %1271 = vset.pattern.permute.xlu0 %v1390_v19  ;;  %1272 = vset.pattern.permute.xlu1 %v1390_v19 }
 0x131   : > { %v676_v54 = vsel %vm675_vm7, %v1293_v13, %v672_v50  ;;  %vm645_vm13 = vmor %vm643_vm9, %vm644_vm10 }
 0x132   : > { %v707_v51 = vpack.c.bf16 %v700_v40, %v699_v46  ;;  %v639_v55 = vmul.f32 %v1297_v41, %v638_v25  ;;  %v684_v31 = vmul.f32 %v676_v54, %v1544_v45  ;;  %v691_v45 = vmul.f32 %v1643_v17, %v680_v61 }
 0x133   : > { %v652_v8 = vmul.f32 %v1295_v35, %v651_v39 }
 0x134   : > { %1148 = vmatmul.msk.bf16.vlgmr.msra.gmra.mxu1 %vm501_vm0, %v707_v51  ;;  %v695_v62 = vmul.f32 %v1643_v17, %v684_v31  ;;  %v640_v63 = vmul.f32 0.5, %v639_v55  ;;  %v702_v43 = vadd.f32 %v1274_v28, %v691_v45 }
 0x135   : > { %v656_v11 = vsel %vm655_vm14, %v1295_v35, %v652_v8 }
 0x136   : > { %v706_v47 = vadd.f32 %v1274_v28, %v695_v62  ;;  %v641_v4 = vsub.f32 1.5, %v640_v63  ;;  %v708_v9 = vpack.c.bf16 %v702_v43, %v701_v7  ;;  %v682_v14 = vmul.f32 %v656_v11, %v1561_v56 }
 0x138   : > { %v710_v3 = vpack.c.bf16 %v706_v47, %v705_v1  ;;  %v642_v29 = vmul.f32 %v1297_v41, %v641_v4  ;;  %v693_v22 = vmul.f32 %v1643_v17, %v682_v14 }
 0x13a   : > { %1151 = vmatmul.msk.bf16.vlgmr.msra.gmra.mxu3 %vm501_vm0, %v710_v3  ;;  %v646_v10 = vsel %vm645_vm13, %v1297_v41, %v642_v29  ;;  %v704_v15 = vadd.f32 %v1274_v28, %v693_v22  ;;  %v1389_v22 = vmov -inf  }
 0x13b   : > { %v681_v13 = vmul.f32 %v646_v10, %v1568_v60  ;;  %v1196_v60 = vld [vmem:[%s1800_s6] sm:$0xff]  ;;  %487 = vst.msk [vmem:[#allocation5] sm:$0xff] %vm486_vm5, %v1389_v22 }
 0x13c   : > { %476 = vmatpush.bf16.msra.mxu0 %v1196_v60  ;;  %v1391_v60 = vmov 0.0  }
 0x13d   : > { %v692_v12 = vmul.f32 %v1643_v17, %v681_v13  ;;  %488 = vst.msk [vmem:[#allocation6] sm:$0xff] %vm486_vm5, %v1391_v60 }
 0x13e   : > { %490 = vst.msk [vmem:[#allocation7] sm:$0xff] %vm489_vm4, %v1391_v60 }
 0x13f   : > { %v703_v5 = vadd.f32 %v1274_v28, %v692_v12  ;;  %v1275_v28 = vld [vmem:[%s1796_s2] ss:$0 sm:$0xff] }
 0x141   : > { %v709_v18 = vpack.c.bf16 %v704_v15, %v703_v5 }
 0x144   : > { %1149 = vmatmul.msk.bf16.gmra.mxu1 %vm501_vm0, %v708_v9 }
 0x154   : > { %1150 = vmatmul.msk.bf16.gmra.mxu1 %vm501_vm0, %v709_v18 }
 0x197   : > { %v427_v56 = vpop.xlane.xlu2 %426 }
 0x198   : > { %v428_v20 = vmul.f32 %v427_v56, %v1596_v34  ;;  %v1276_v34 = vld [vmem:[%s1797_s3] ss:$0 sm:$0xff]  ;;  %v891_v56 = vld [vmem:[#allocation5] sm:$0xff] }
 0x19a   : > { %v429_v30 = vadd.f32 1e-05, %v428_v20 }
 0x19c   : > { %1298 = vrsqrt.f32 %v429_v30  ;;  %vm436_vm15 = vweird.f32 %v429_v30 }
 0x1a2   : > { %v1299_v17 = vpop.eup %1298 }
 0x1a3   : > { %v431_v21 = vmul.f32 %v1299_v17, %v429_v30  ;;  %vm437_vm0 = vweird.f32 %v1299_v17 }
 0x1a4   : > { %vm438_vm1 = vmor %vm436_vm15, %vm437_vm0 }
 0x1a5   : > { %v432_v23 = vmul.f32 %v1299_v17, %v431_v21 }
 0x1a7   : > { %v433_v26 = vmul.f32 0.5, %v432_v23 }
 0x1a9   : > { %v434_v27 = vsub.f32 1.5, %v433_v26 }
 0x1ab   : > { %v435_v24 = vmul.f32 %v1299_v17, %v434_v27 }
 0x1ad   : > { %v439_v32 = vsel %vm438_vm1, %v1299_v17, %v435_v24 }
 0x1ae   : > { %v440_v33 = vmul.f32 %v439_v32, %v1613_v52 }
 0x1b0   : > { %v444_v36 = vmul.f32 %v1275_v28, %v440_v33 }
 0x1b1   : > { %v748_v44 = vpop.f32.mrf.mxu1 }
 0x1b2   : > { %v768_v35 = vpack.c.bf16 %v748_v44, %v748_v44  ;;  %v448_v37 = vadd.f32 %v1276_v34, %v444_v36  ;;  %v908_v34 = vld [vmem:[#allocation6] sm:$0xff] }
 0x1b4   : > { %777 = vst.msk [vmem:[#allocation3] sm:$0xf] %vm484_vm3, %v768_v35  ;;  %v449_v38 = vpack.c.bf16 %v448_v37, %v448_v37 }
 0x1b6   : > { %1143 = vmatmul.msk.bf16.vlgmr.msra.gmra.mxu0 %vm411_vm2, %v449_v38 }
 0x1b9   : > { %v750_v40 = vpop.f32.mrf.mxu1 }
 0x1ba   : > { %v769_v41 = vpack.c.bf16 %v750_v40, %v750_v40 }
 0x1bc   : > { %778 = vst.msk [vmem:[#allocation3 + $0x4] sm:$0xf] %vm484_vm3, %v769_v41 }
 0x1bd   : > { %v763_v42 = vpop.f32.mrf.mxu3 }
 0x1be   : > { %v774_v52 = vpack.c.bf16 %v763_v42, %v763_v42 }
 0x1c0   : > { %783 = vst.msk [vmem:[#allocation3 + $0x18] sm:$0xf] %vm484_vm3, %v774_v52  ;;  %805 = vrot.lane.b32.xlu1 %v774_v52, %s1388_s12  ;;  %v916_v52 = vld [vmem:[#allocation7] sm:$0xff] }
 0x1c1   : > { %v753_v46 = vpop.f32.mrf.mxu1 }
 0x1c2   : > { %v770_v16 = vpack.c.bf16 %v753_v46, %v753_v46 }
 0x1c3   : > { %v1199_v0 = vld [vmem:[#allocation3] sm:$0xff] }
 0x1c4   : > { %779 = vst.msk [vmem:[#allocation3 + $0x8] sm:$0xf] %vm484_vm3, %v770_v16  ;;  %v867_v1 = vsel %vm489_vm4, %v1199_v0, 0  ;;  %v1277_v0 = vld [vmem:[%s1803_s9] ss:$0 sm:$0xff] }
 0x1c5   : > { %v765_v48 = vpop.f32.mrf.mxu3 }
 0x1c6   : > { %v775_v50 = vpack.c.bf16 %v765_v48, %v765_v48 }
 0x1c8   : > { %784 = vst.msk [vmem:[#allocation3 + $0x1c] sm:$0xf] %vm484_vm3, %v775_v50  ;;  %797 = vrot.lane.b32.xlu1 %v770_v16, %s1388_s12  ;;  %807 = vrot.lane.b32.xlu2 %v775_v50, %s1388_s12 }
 0x1c9   : > { %v755_v25 = vpop.f32.mrf.mxu1 }
 0x1ca   : > { %v771_v51 = vpack.c.bf16 %v755_v25, %v755_v25 }
 0x1cc   : > { %780 = vst.msk [vmem:[#allocation3 + $0xc] sm:$0xf] %vm484_vm3, %v771_v51  ;;  %799 = vrot.lane.b32.xlu0 %v771_v51, %s1388_s12 }
 0x1cf   : > { %v1202_v54 = vld [vmem:[#allocation3 + $0x18] sm:$0xff] }
 0x1d0   : > { %795 = vrot.lane.b32.xlu1 %v769_v41, %s1388_s12  ;;  %v876_v31 = vsel %vm489_vm4, %v1202_v54, 0  ;;  %v1207_v41 = vld [vmem:[%s1802_s8] sm:$0xff] }
 0x1d1   : > { %v758_v53 = vpop.f32.mrf.mxu1  ;;  %882 = vmatpush.bf16.xpose.msra.mxu2 %v876_v31  ;;  %1015 = vmatpush.bf16.msrb.mxu0 %v1207_v41 }
 0x1d2   : > { %v772_v55 = vpack.c.bf16 %v758_v53, %v758_v53 }
 0x1d3   : > { %v1200_v62 = vld [vmem:[#allocation3 + $0x8] sm:$0xff] }
 0x1d4   : > { %781 = vst.msk [vmem:[#allocation3 + $0x10] sm:$0xf] %vm484_vm3, %v772_v55  ;;  %801 = vrot.lane.b32.xlu0 %v772_v55, %s1388_s12  ;;  %v870_v63 = vsel %vm489_vm4, %v1200_v62, 0 }
 0x1d9   : > { %v760_v49 = vpop.f32.mrf.mxu1 }
 0x1da   : > { %v773_v58 = vpack.c.bf16 %v760_v49, %v760_v49 }
 0x1dc   : > { %782 = vst.msk [vmem:[#allocation3 + $0x14] sm:$0xf] %vm484_vm3, %v773_v58  ;;  %803 = vrot.lane.b32.xlu2 %v773_v58, %s1388_s12 }
 0x1e3   : > { %v1201_v59 = vld [vmem:[#allocation3 + $0x10] sm:$0xff] }
 0x1e4   : > { %793 = vrot.lane.b32.xlu2 %v768_v35, %s1388_s12  ;;  %v873_v61 = vsel %vm489_vm4, %v1201_v59, 0  ;;  %s1036_s12 = scalar_lea.hbm %s1804_s10, %s1192_s27 }
 0x1e5   : > { %883 = vmatpush.bf16.xpose.msra.mxu2 %v873_v61  ;;  %s1040_s0 = sshll.u32 %s1036_s12, 4  ;;  %s1041_s0 = int_to_ptr.hbm [resolvable:$true] %s1040_s0 }
 0x1e6   : > { %s1320_s1 = sshra.s32 %s1041_s0, 4  ;;  %s1321_s1 = int_to_ptr.hbm [resolvable:$true] %s1320_s1 }
 0x1e7   : > { %s1322_s28 = scalar_lea.hbm %s1321_s1, 8  ;;  %p1327_p1 = scmp.lt.s32.totalorder %s1321_s1, %s1804_s10 }
 0x1e8   : > { %p1323_p12 = scmp.ne.s32.totalorder %s1321_s1, %s1322_s28  ;;  %p1328_p2 = scmp.lt.s32.totalorder %s1326_s24, %s1322_s28 }
 0x1ea   : > { %p1324_p13 = pnand %p1323_p12, %p1487_p4  ;;  %p1329_p3 = por %p1328_p2, %p1327_p1 }
 0x1ec   : > { %p1325_p0 = pneg %p1324_p13 }
 0x1ed   : > { %884 = vmatpush.bf16.xpose.msra.mxu2 %v870_v63 }
 0x1ee   : > { %p1330_p5 = pnand %p1329_p3, %p1325_p0 }
 0x1f5   : > { %885 = vmatpush.bf16.xpose.msra.mxu2 %v867_v1 }
 0x222   : > { %v808_v47 = vpop.permute.xlu2 %807 }
 0x223   : > { %824 = vst.msk [vmem:[#allocation4 + $0x1c] sm:$0xf] %vm484_vm3, %v808_v47 }
 0x232   : > { %v806_v2 = vpop.permute.xlu1 %805 }
 0x233   : > { %823 = vst.msk [vmem:[#allocation4 + $0x18] sm:$0xf] %vm484_vm3, %v806_v2  ;;  %v478_v3 = vpop.f32.mrf.mxu0 }
 0x234   : > { %v482_v45 = vmul.f32 0.25, %v478_v3 }
 0x236   : > { %v804_v4 = vpop.permute.xlu2 %803  ;;  %v483_v6 = vpack.c.bf16 %v482_v45, %v482_v45 }
 0x237   : > { %822 = vst.msk [vmem:[#allocation4 + $0x14] sm:$0xf] %vm484_vm3, %v804_v4 }
 0x238   : > { %485 = vst.msk [vmem:[#allocation2] sm:$0xf] %vm484_vm3, %v483_v6 }
 0x23a   : > { %v798_v39 = vpop.permute.xlu1 %797  ;;  %v1206_v43 = vld [vmem:[#allocation4 + $0x18] sm:$0xff] }
 0x23b   : > { %819 = vst.msk [vmem:[#allocation4 + $0x8] sm:$0xf] %vm484_vm3, %v798_v39  ;;  %v480_v29 = vpop.f32.mrf.mxu0  ;;  %955 = vmatpush.bf16.msrb.mxu3 %v1206_v43 }
 0x23e   : > { %v794_v7 = vpop.permute.xlu2 %793  ;;  %v800_v8 = vpop.permute.xlu0 %799 }
 0x23f   : > { %817 = vst.msk [vmem:[#allocation4] sm:$0xf] %vm484_vm3, %v794_v7  ;;  %v825_v9 = vld [vmem:[#allocation2] sm:$0xf] }
 0x240   : > { %820 = vst.msk [vmem:[#allocation4 + $0xc] sm:$0xf] %vm484_vm3, %v800_v8  ;;  %1168 = vmatmul.msk.bf16.vlgmr.msra.gmra.mxu2 %vm489_vm4, %v825_v9 }
 0x242   : > { %v796_v10 = vpop.permute.xlu1 %795 }
 0x243   : > { %818 = vst.msk [vmem:[#allocation4 + $0x4] sm:$0xf] %vm484_vm3, %v796_v10 }
 0x246   : > { %v802_v11 = vpop.permute.xlu0 %801 }
 0x247   : > { %821 = vst.msk [vmem:[#allocation4 + $0x10] sm:$0xf] %vm484_vm3, %v802_v11  ;;  %v1204_v14 = vld [vmem:[#allocation4 + $0x8] sm:$0xff] }
 0x24a   : > { %v1203_v12 = vld [vmem:[#allocation4] sm:$0xff] }
 0x24e   : > { %v1205_v13 = vld [vmem:[#allocation4 + $0x10] sm:$0xff] }
 0x24f   : > { %956 = vmatpush.bf16.msrb.mxu3 %v1205_v13 }
 0x253   : > { %957 = vmatpush.bf16.msrb.mxu3 %v1204_v14 }
 0x257   : > { %958 = vmatpush.bf16.msrb.mxu3 %v1203_v12 }
 0x2c3   : > { %v887_v5 = vpop.f32.mrf.mxu2 }
 0x2c4   : > { %v893_v15 = vsel %vm892_vm6, %v887_v5, -inf }
 0x2c5   : > { %894 = vmax.xlane.f32.xlu0 %v893_v15 }
 0x2cb   : > { %v889_v18 = vpop.f32.mrf.mxu2 }
 0x338   : > { %v895_v20 = vpop.xlane.xlu0 %894 }
 0x339   : > { %v896_v30 = vmax.f32 %v891_v56, %v895_v20 }
 0x33b   : > { %v897_v17 = vsub.f32 %v891_v56, %v896_v30  ;;  %966 = vst.msk [vmem:[#allocation5] sm:$0xff] %vm486_vm5, %v896_v30  ;;  %902 = vperm.xlu0 %1271, %v896_v30  }
 0x33d   : > { %v898_v32 = vmul.f32 1.442695, %v897_v17 }
 0x3ad   : > { %v903_v21 = vpop.permute.xlu0 %902 }
 0x3ae   : > { %v905_v23 = vsub.f32 %v887_v5, %v903_v21 }
 0x3b0   : > { %v906_v26 = vmul.f32 1.442695, %v905_v23 }
 0x3b2   : > { %1300 = vpow2.f32 %v906_v26 }
 0x3b3   : > { %1302 = vpow2.f32 %v898_v32 }
 0x3b8   : > { %v1301_v27 = vpop.eup %1300 }
 0x3b9   : > { %v910_v24 = vsel %vm892_vm6, %v1301_v27, 0.0  ;;  %v923_v28 = vpack.c.bf16 %v1301_v27, %v1301_v27  ;;  %v1303_v33 = vpop.eup %1302 }
 0x3ba   : > { %911 = vadd.xlane.f32.xlu2 %v910_v24  ;;  %v909_v44 = vmul.f32 %v1303_v33, %v908_v34 }
 0x3bb   : > { %1185 = vmatmul.msk.bf16.vlgmr.msrb.gmra.mxu3 %vm892_vm6, %v923_v28 }
 0x42d   : > { %v912_v35 = vpop.xlane.xlu2 %911 }
 0x42e   : > { %v913_v36 = vadd.f32 %v912_v35, %v909_v44 }
 0x430   : > { %915 = vst.msk [vmem:[#allocation6] sm:$0xff] %vm486_vm5, %v913_v36 }
 0x437   : > { %v971_v37 = vld [vmem:[#allocation6] sm:$0xff] }
 0x438   : > { %974 = vperm.xlu1 %1272, %v971_v37  }
 0x43e   : > { %v960_v38 = vpop.f32.mrf.mxu3 }
 0x440   : > { %919 = vperm.xlu1 %1272, %v1303_v33  }
 0x446   : > { %v962_v40 = vpop.f32.mrf.mxu3 }
 0x4aa   : > { %v975_v42 = vpop.permute.xlu1 %974 }
 0x4ab   : > { %1304 = vrcp.f32 %v975_v42  ;;  %v988_v55 = vand.u32 2147483648, %v975_v42  ;;  %vm982_vm8 = vweird.f32 %v975_v42  ;;  %v986_v31 = vand.u32 2147483647, %v975_v42 }
 0x4ad   : > { %v989_v58 = vor.u32 1.1754944e-38, %v988_v55  ;;  %vm987_vm10 = vcmp.eq.f32.partialorder %v986_v31, 8.507059e+37 }
 0x4b1   : > { %v1305_v46 = vpop.eup %1304 }
 0x4b2   : > { %v978_v16 = vmul.f32 %v1305_v46, %v975_v42  ;;  %v920_v48 = vpop.permute.xlu1 %919  ;;  %vm983_vm7 = vweird.f32 %v1305_v46 }
 0x4b3   : > { %v922_v50 = vmul.f32 %v920_v48, %v916_v52  ;;  %vm984_vm9 = vmor %vm982_vm8, %vm983_vm7 }
 0x4b4   : > { %v979_v25 = vsub.f32 1.0, %v978_v16 }
 0x4b5   : > { %v964_v51 = vadd.f32 %v960_v38, %v922_v50 }
 0x4b6   : > { %v980_v53 = vmul.f32 %v1305_v46, %v979_v25 }
 0x4b7   : > { %965 = vst.msk [vmem:[#allocation7] sm:$0xff] %vm489_vm4, %v964_v51 }
 0x4b8   : > { %v981_v54 = vadd.f32 %v1305_v46, %v980_v53 }
 0x4ba   : > { %v985_v49 = vsel %vm984_vm9, %v1305_v46, %v981_v54 }
 0x4bb   : > { %v990_v61 = vsel %vm987_vm10, %v989_v58, %v985_v49 }
 0x4be   : > { %v970_v59 = vld [vmem:[#allocation7] sm:$0xff] }
 0x4bf   : > { %v991_v62 = vmul.f32 %v990_v61, %v970_v59 }
 0x4c1   : > { %v992_v63 = vpack.c.bf16 %v991_v62, %v991_v62 }
 0x4c3   : > { %1190 = vmatmul.msk.bf16.vlgmr.msrb.gmra.mxu0 %vm489_vm4, %v992_v63 }
 0x540   : > { %v1017_v1 = vpop.f32.mrf.mxu0 }
 0x541   : > { %v1018_v47 = vadd.f32 %v1277_v0, %v1017_v1 }
 0x543   : > { %v1022_v2 = vadd.f32 %v1018_v47, %v1563_v57 }
 0x545   : > { %1024 = vst.msk [vmem:[%s388_s19] sm:$0xff] %vm411_vm2, %v1022_v2 }
 0x546   : > { %1333 = shalt.err (!%p1330_p5)
}
 0x547   : > { %1210 = dma.vmem_to_hbm [thread:$0]  (%p1487_p4), %s1039_s20, 128, %s1041_s0, %s1026_s16  }
 0x548   : > { %v1019_v57 = vpop.f32.mrf.mxu0 }
 0x549 PF: > { %p1216_p6 = scmp.ge.s32.totalorder %s1384_s18, 2  ;;  %s1052_s22 = sand.u32 1, %s1364_s13  }
 0x54a   : > { %s1053_s12 = scalar_lea.sflag [#allocation9], %s1052_s22 }
 0x54b   : > { %p1213_p7 = pnand %p1216_p6, %p1494_p8 }
 0x54d   : > { %p1214_p9 = pneg %p1213_p7 }
 0x54f   : > { %1359 = dma.done.wait (%p1214_p9), %s1053_s12, 128  }
 0x550   : > { %1361 = vsyncadd (%p1214_p9), %s1053_s12, 4294967168  ;;  %s23_s18 = sadd.s32 1, %s1384_s18   ;;  %s1817_s13 = smov %s1368_s14 }
 0x551   : > { %p20_p10 = scmp.ge.s32.totalorder %s23_s18, 4   ;;  %s1818_s14 = smov %s1372_s15 }
 0x552   : > { %s1819_s15 = smov %s1500_s26  ;;  %s1820_s16 = smov %s1380_s17 }
 0x553   : > { %s1821_s17 = smov %s1823_s21  ;;  %22 = sbr.rel (!%p20_p10) target bundleno = 7 (0x7), region = 106 }
 0x558   :  { %1059 = vsyncpa [#allocation9], 1 }
 0x559   :  { %1061 = vsyncpa [#allocation9 + $0x1], 1 }

</bundles_post_ra>
